<compile_context>
chip_gen: v6e
topology: v6e:2x2x1
jax: 0.10.0
libtpu: 0.0.40
codegen_flags: <defaults>
</compile_context>

<pallas_src>
import functools

import jax
import jax.numpy as jnp
from jax.experimental import pallas as pl
from jax.experimental.pallas import tpu as pltpu


def _round_up(v, m):
    return ((v + m - 1) // m) * m


def _physical_vmem_bytes():
    try:
        return int(pltpu.get_tpu_info().vmem_capacity_bytes)
    except Exception:
        return 64 << 20  # conservative fallback (v7x per-core VMEM)


def _vmem_cap():
    # Leave ~25% of physical VMEM for the compiler's own scratch / other allocations.
    return int(0.75 * _physical_vmem_bytes())


def _clamp_vmem(needed):
    return int(min(max(int(needed), 16 << 20), _vmem_cap()))


# ----------------------------- small single-block path -----------------------------

def _pair_norm_small_kernel(x_ref, o_ref, *, n_rows):
    x = x_ref[...].astype(jnp.float32)
    inv_n = jnp.float32(1.0 / n_rows)
    mu = jnp.sum(x, axis=0, keepdims=True) * inv_n               # (1, D) column mean
    total_sq = jnp.sum(x * x)                                    # sum ||x_i||^2
    # Shift formula avoids holding an xc temp across the reduction; clamp guards
    # against catastrophic cancellation producing a tiny negative value -> NaN.
    centered = jnp.maximum(total_sq - jnp.float32(n_rows) * jnp.sum(mu * mu), 0.0)
    inv = jax.lax.rsqrt(jnp.float32(1e-6) + centered * inv_n)    # scalar rsqrt (EUP)
    o_ref[...] = ((x - mu) * inv).astype(o_ref.dtype)            # broadcast multiply


def _pair_norm_small(x):
    n, d = x.shape
    elem = jnp.dtype(x.dtype).itemsize
    needed = n * d * (2 * elem + 8) + (2 << 20)  # in + out + ~2 f32-sized temps
    return pl.pallas_call(
        functools.partial(_pair_norm_small_kernel, n_rows=n),
        out_shape=jax.ShapeDtypeStruct((n, d), x.dtype),
        in_specs=[pl.BlockSpec(memory_space=pltpu.MemorySpace.VMEM)],
        out_specs=pl.BlockSpec(memory_space=pltpu.MemorySpace.VMEM),
        compiler_params=pltpu.CompilerParams(vmem_limit_bytes=_clamp_vmem(needed)),
        cost_estimate=pl.CostEstimate(flops=5 * n * d, transcendentals=1,
                                      bytes_accessed=2 * n * d * elem),
    )(x)


# ------------------------------- tiled two-pass path -------------------------------

def _pair_norm_stats_kernel(x_ref, stats_ref, *, n_rows, tm, tiles_per_split):
    c = pl.program_id(0)          # core-split index (sharded on v7x megacore)
    i = pl.program_id(1)          # row-tile index within this split

    @pl.when(i == 0)
    def _init():
        stats_ref[...] = jnp.zeros_like(stats_ref)

    t = c * tiles_per_split + i                                  # logical tile index
    x = x_ref[...].astype(jnp.float32)                           # (tm, D); OOB rows garbage
    row = t * tm + jax.lax.broadcasted_iota(jnp.int32, x.shape, 0)
    xm = jnp.where(row < n_rows, x, 0.0)                         # mask ragged/duplicate tiles
    col_sum = jnp.sum(xm, axis=0, keepdims=True)                 # (1, D) partial column sum
    sq = jnp.sum(xm * xm)                                        # partial sum of squares
    contrib = jnp.concatenate(
        [col_sum, jnp.broadcast_to(sq, (1, col_sum.shape[1]))], axis=0)  # (2, D)
    stats_ref[...] = stats_ref[...] + contrib


def _pair_norm_scale_kernel(x_ref, stats_ref, o_ref, *, n_rows):
    x = x_ref[...].astype(jnp.float32)
    stats = stats_ref[...]                                       # (n_split, 2, D) f32
    inv_n = jnp.float32(1.0 / n_rows)
    mu = jnp.sum(stats[:, 0:1, :], axis=0) * inv_n               # combine cores -> (1, D)
    total_sq = jnp.sum(stats[:, 1:2, 0:1])                       # combine cores -> scalar
    centered = jnp.maximum(total_sq - jnp.float32(n_rows) * jnp.sum(mu * mu), 0.0)
    inv = jax.lax.rsqrt(jnp.float32(1e-6) + centered * inv_n)
    o_ref[...] = ((x - mu) * inv).astype(o_ref.dtype)


def _pair_norm_tiled(x, tm):
    n, d = x.shape
    elem = jnp.dtype(x.dtype).itemsize
    n_tiles = pl.cdiv(n, tm)
    n_split = 2 if n_tiles >= 2 else 1      # shard pass-1 over v7x's 2 TCs; ~free on 1-TC chips
    tiles_per_split = pl.cdiv(n_tiles, n_split)

    tile_in = tm * d * elem
    tile_f32 = tm * d * 4
    stats_bytes = n_split * 2 * d * 4

    # Pass 1: per-core partial column sums + partial sum-of-squares.
    vmem1 = _clamp_vmem(2 * tile_in + 2 * tile_f32 + 2 * stats_bytes + (4 << 20))
    stats = pl.pallas_call(
        functools.partial(_pair_norm_stats_kernel, n_rows=n, tm=tm,
                          tiles_per_split=tiles_per_split),
        out_shape=jax.ShapeDtypeStruct((n_split, 2, d), jnp.float32),
        grid=(n_split, tiles_per_split),
        in_specs=[pl.BlockSpec(
            (tm, d),
            lambda c, i: (jnp.minimum(c * tiles_per_split + i, n_tiles - 1), 0))],
        out_specs=pl.BlockSpec((None, 2, d), lambda c, i: (c, 0, 0)),
        compiler_params=pltpu.CompilerParams(
            dimension_semantics=("parallel", "arbitrary"),
            vmem_limit_bytes=vmem1),
        cost_estimate=pl.CostEstimate(flops=3 * n * d, transcendentals=0,
                                      bytes_accessed=n * d * elem + stats_bytes),
    )(x)

    # Pass 2: stream row tiles, combine the per-core partials and write (x - mu) * inv.
    vmem2 = _clamp_vmem(2 * tile_in + 2 * tm * d * elem + 2 * tile_f32
                        + stats_bytes + (4 << 20))
    out = pl.pallas_call(
        functools.partial(_pair_norm_scale_kernel, n_rows=n),
        out_shape=jax.ShapeDtypeStruct((n, d), x.dtype),
        grid=(n_tiles,),
        in_specs=[pl.BlockSpec((tm, d), lambda i: (i, 0)),
                  pl.BlockSpec((n_split, 2, d), lambda i: (0, 0, 0))],
        out_specs=pl.BlockSpec((tm, d), lambda i: (i, 0)),
        compiler_params=pltpu.CompilerParams(
            dimension_semantics=("parallel",),
            vmem_limit_bytes=vmem2),
        cost_estimate=pl.CostEstimate(flops=2 * n * d, transcendentals=int(n_tiles),
                                      bytes_accessed=2 * n * d * elem + stats_bytes),
    )(x, stats)
    return out


# ---------------------------------- public wrapper ----------------------------------

def pair_norm(x, *, tile_rows=None):
    """PairNorm forward. x: (N, D)."""
    n, d = x.shape
    elem = jnp.dtype(x.dtype).itemsize
    pack = max(1, 4 // max(elem, 1))
    row_mult = 8 * pack  # sublane packing: 8 rows f32, 16 bf16, 32 int8/fp8

    # Single-block path: whole array resident in VMEM -> one HBM read + one write,
    # no grid bookkeeping. Threshold derived from this generation's physical VMEM.
    small_needed = n * d * (2 * elem + 8) + (2 << 20)  # in + out + ~2 f32 temps
    if tile_rows is None and small_needed <= _vmem_cap():
        return _pair_norm_small(x)

    if tile_rows is not None:
        tm = max(row_mult, _round_up(int(tile_rows), row_mult))
    else:
        # ~4 MiB (f32-equivalent) row tiles: >=85% of HBM roofline, few grid steps,
        # and double-buffered in+out stays well under the per-generation VMEM cap.
        tm = max(row_mult, ((4 << 20) // (d * 4)) // row_mult * row_mult)
    tm = min(tm, _round_up(n, row_mult))
    return _pair_norm_tiled(x, tm)


def pair_norm_ref(x):
    """Pure-JAX reference matching the PyTorch module exactly."""
    col_mean = x.mean(axis=0)
    xc = x - col_mean
    rownorm_mean = jnp.sqrt(1e-6 + (xc ** 2).sum(axis=1).mean())
    return xc / rownorm_mean


if __name__ == "__main__":
    key = jax.random.PRNGKey(0)
    k1, k2 = jax.random.split(key)

    # Small-graph path: single grid-less call, whole (unpadded) array in VMEM.
    x_small = jax.random.normal(k1, (8, 32), dtype=jnp.float32)
    out_small = jax.block_until_ready(pair_norm(x_small))
    ref_small = pair_norm_ref(x_small)
    assert out_small.shape == ref_small.shape and out_small.dtype == ref_small.dtype
    assert jnp.allclose(out_small, ref_small, atol=1e-5, rtol=1e-5), "small path mismatch"

    # Tiled two-pass path: forced small tile exercises the 2-way core split,
    # multi-step accumulation, and the masked ragged last row tile (60 = 3*16 + 12),
    # with an unpadded non-128 feature width (48).
    x_big = jax.random.normal(k2, (60, 48), dtype=jnp.float32)
    out_big = jax.block_until_ready(pair_norm(x_big, tile_rows=16))
    ref_big = pair_norm_ref(x_big)
    assert out_big.shape == ref_big.shape and out_big.dtype == ref_big.dtype
    assert jnp.allclose(out_big, ref_big, atol=1e-5, rtol=1e-5), "tiled path mismatch"

    print("KERNEL_OK")
</pallas_src>

<mosaic_0001>
module attributes {stable_mosaic.version = 11 : i64} {
  func.func @_pair_norm_small_kernel(%arg0: memref<8x32xf32, #tpu.memory_space<vmem>>, %arg1: memref<8x32xf32, #tpu.memory_space<vmem>>) attributes {dimension_semantics = [], scalar_prefetch = 0 : i64, scratch_operands = 0 : i64, tpu.core_type = #tpu.core_type<tc>} {
    %c0 = arith.constant 0 : index
    %c0_0 = arith.constant 0 : index
    %0 = vector.load %arg0[%c0, %c0_0] : memref<8x32xf32, #tpu.memory_space<vmem>>, vector<8x32xf32>
    %cst = arith.constant dense<0.000000e+00> : vector<32xf32>
    %1 = vector.multi_reduction <add>, %0, %cst [0] : vector<8x32xf32> to vector<32xf32>
    %2 = vector.shape_cast %1 : vector<32xf32> to vector<1x32xf32>
    %cst_1 = arith.constant 1.250000e-01 : f32
    %3 = vector.broadcast %cst_1 : f32 to vector<1x32xf32>
    %4 = arith.mulf %2, %3 : vector<1x32xf32>
    %5 = arith.mulf %0, %0 : vector<8x32xf32>
    %6 = vector.shape_cast %5 : vector<8x32xf32> to vector<1x8x32xf32>
    %cst_2 = arith.constant dense<0.000000e+00> : vector<1xf32>
    %7 = vector.multi_reduction <add>, %6, %cst_2 [1, 2] : vector<1x8x32xf32> to vector<1xf32>
    %8 = vector.shape_cast %7 : vector<1xf32> to vector<1x1x1xf32>
    %9 = vector.extract %8[0, 0, 0] : f32 from vector<1x1x1xf32>
    %10 = arith.mulf %4, %4 : vector<1x32xf32>
    %11 = vector.shape_cast %10 : vector<1x32xf32> to vector<1x1x32xf32>
    %cst_3 = arith.constant dense<0.000000e+00> : vector<1xf32>
    %12 = vector.multi_reduction <add>, %11, %cst_3 [1, 2] : vector<1x1x32xf32> to vector<1xf32>
    %13 = vector.shape_cast %12 : vector<1xf32> to vector<1x1x1xf32>
    %14 = vector.extract %13[0, 0, 0] : f32 from vector<1x1x1xf32>
    %cst_4 = arith.constant 8.000000e+00 : f32
    %15 = arith.mulf %cst_4, %14 : f32
    %16 = arith.subf %9, %15 : f32
    %cst_5 = arith.constant 0.000000e+00 : f32
    %17 = arith.maximumf %16, %cst_5 : f32
    %cst_6 = arith.constant 1.250000e-01 : f32
    %18 = arith.mulf %17, %cst_6 : f32
    %cst_7 = arith.constant 9.99999997E-7 : f32
    %19 = arith.addf %cst_7, %18 : f32
    %20 = math.rsqrt %19 : f32
    %21 = vector.broadcast %4 : vector<1x32xf32> to vector<8x32xf32>
    %22 = arith.subf %0, %21 : vector<8x32xf32>
    %23 = vector.broadcast %20 : f32 to vector<8x32xf32>
    %24 = arith.mulf %22, %23 : vector<8x32xf32>
    %c0_8 = arith.constant 0 : index
    %c0_9 = arith.constant 0 : index
    %25 = vector.load %arg1[%c0_8, %c0_9] : memref<8x32xf32, #tpu.memory_space<vmem>>, vector<8x32xf32>
    tpu.vector_store %arg1[%c0_8, %c0_9], %24 {strides = array<i32>} : memref<8x32xf32, #tpu.memory_space<vmem>>, vector<8x32xf32>,
    return
  }
}

</mosaic_0001>

<bundles_post_ra>
// kernel: tpu_custom_call.1
= control target key start
LH: loop header
LB: loop body
LE: loop exit
PB: predicated region body
PF: predicated region fallthrough
CT: control target
= control target key end

     0   :  { %6 = vsyncpa [#allocation3], 0  ;;  %s158_s0 = inlined_call_operand.hbm [shape: f32[8,32], index: 0, kind: input, shape index: {}]   ;;  %s159_s1 = inlined_call_operand.hbm [shape: f32[8,32], index: 1, kind: output, shape index: {}]  }
   0x1   :  { %7 = vsyncpa [#allocation4], 0  ;;  %s136_s6 = smov [#allocation2]  }
   0x2   :  { %s14_s7 = sshll.u32 %s136_s6, 4  ;;  %s15_s7 = int_to_ptr.vmem [resolvable:$true] %s14_s7 }
   0x3   :  { %s100_s8 = scalar_lea.vmem %s15_s7, 128  ;;  %p105_p1 = scmp.lt.s32.totalorder %s15_s7, %s15_s7 }
   0x4   :  { %p101_p0 = scmp.ne.s32.totalorder %s15_s7, %s100_s8  ;;  %p106_p2 = scmp.lt.s32.totalorder %s100_s8, %s100_s8 }
   0x6   :  { %p107_p3 = por %p106_p2, %p105_p1 }
   0x8   :  { %p108_p4 = pnand %p107_p3, %p101_p0 }
   0xa   :  { %111 = shalt.err (!%p108_p4)
}
   0xb   :  { %17 = dma.hbm_to_vmem [thread:$0]  %s158_s0, 128, %s15_s7, [#allocation3]  }
   0xc   :  { %132 = dma.done.wait [#allocation3], 128  }
   0xd   :  { %133 = vsyncadd [#allocation3], 4294967168  ;;  %vm22_vm0 = vcmask 261120   ;;  %v21_v0 = vld [vmem:[#allocation2] sm:$0xff]  ;;  %vm43_vm1 = vcmask 253952   ;;  %s137_s14 = smov 0.0  }
   0xe   :  { %v31_v1 = vmul.f32 %v21_v0, %v21_v0  ;;  %v23_v2 = vsel %vm22_vm0, %v21_v0, 0.0  ;;  %s138_s18 = smov [#allocation5]  }
   0xf   :  { %v24_v3 = vrot.slane %v23_v2, 4  ;;  %s72_s19 = sshll.u32 %s138_s18, 4  ;;  %s73_s19 = int_to_ptr.vmem [resolvable:$true] %s72_s19 }
  0x10   :  { %v32_v4 = vsel %vm22_vm0, %v31_v1, 0.0  ;;  %s112_s21 = scalar_lea.vmem %s73_s19, 128  ;;  %p117_p6 = scmp.lt.s32.totalorder %s73_s19, %s73_s19 }
  0x11   :  { %33 = vadd.xlane.f32.xlu0 %v32_v4  ;;  %v25_v5 = vadd.f32 %v24_v3, %v23_v2  ;;  %p113_p5 = scmp.ne.s32.totalorder %s73_s19, %s112_s21  ;;  %p118_p7 = scmp.lt.s32.totalorder %s112_s21, %s112_s21 }
  0x13   :  { %v26_v6 = vrot.slane %v25_v5, 2  ;;  %p119_p8 = por %p118_p7, %p117_p6 }
  0x15   :  { %v27_v7 = vadd.f32 %v26_v6, %v25_v5  ;;  %p120_p9 = pnand %p119_p8, %p113_p5 }
  0x17   :  { %v28_v8 = vrot.slane %v27_v7, 1 }
  0x19   :  { %v29_v9 = vadd.f32 %v28_v8, %v27_v7 }
  0x1b   :  { %v30_v10 = vmul.f32 0.125, %v29_v9 }
  0x1d   :  { %v42_v11 = vmul.f32 %v30_v10, %v30_v10  ;;  %v62_v29 = vsub.f32 %v21_v0, %v30_v10 }
  0x1f   :  { %v44_v12 = vsel %vm43_vm1, %v42_v11, 0.0 }
  0x20   :  { %45 = vadd.xlane.f32.xlu0 %v44_v12 }
  0x9a   :  { %v34_v13 = vpop.xlane.xlu0 %33 }
  0x9b   :  { %v35_v14 = vrot.slane %v34_v13, 4 }
  0x9d   :  { %v36_v15 = vadd.f32 %v35_v14, %v34_v13 }
  0x9f   :  { %v37_v16 = vrot.slane %v36_v15, 2 }
  0xa1   :  { %v38_v17 = vadd.f32 %v37_v16, %v36_v15 }
  0xa3   :  { %v39_v18 = vrot.slane %v38_v17, 1 }
  0xa5   :  { %v40_v19 = vadd.f32 %v39_v18, %v38_v17 }
  0xa7   :  { %81 = vpush %v40_v19 }
  0xa9   :  { %v46_v20 = vpop.xlane.xlu0 %45 }
  0xaa   :  { %v47_v21 = vrot.slane %v46_v20, 4 }
  0xac   :  { %v48_v22 = vadd.f32 %v47_v21, %v46_v20 }
  0xae   :  { %v49_v23 = vrot.slane %v48_v22, 2 }
  0xb0   :  { %v50_v24 = vadd.f32 %v49_v23, %v48_v22 }
  0xb2   :  { %v51_v25 = vrot.slane %v50_v24, 1 }
  0xb4   :  { %v52_v26 = vadd.f32 %v51_v25, %v50_v24 }
  0xb6   :  { %83 = vpush %v52_v26 }
  0xd8   :  { %s82_s0 = spop %81 }
  0xe7   :  { %s84_s11 = spop %83 }
  0xe8   :  { %s54_s12 = smul.f32 8.0, %s84_s11 }
  0xea   :  { %s55_s13 = ssub.f32 %s82_s0, %s54_s12 }
  0xec   :  { %s56_s15 = smax.f32 %s137_s14, %s55_s13 }
  0xed   :  { %s57_s16 = smul.f32 0.125, %s56_s15 }
  0xef   :  { %s58_s17 = sadd.f32 1e-06, %s57_s16 }
  0xf1   :  { %v59_v27 = vstv %s58_s17 }
  0xf2   :  { %90 = vrsqrt.f32 %v59_v27 }
  0xff   :  { %v91_v28 = vpop.eup %90 }
 0x100   :  { %85 = vpush %v91_v28 }
 0x131   :  { %s86_s20 = spop %85 }
 0x132   :  { %v63_v30 = vstv %s86_s20 }
 0x133   :  { %v64_v31 = vmul.f32 %v63_v30, %v62_v29 }
 0x135   :  { %65 = vst.msk [vmem:[#allocation5] sm:$0xff] %vm22_vm0, %v64_v31 }
 0x136   :  { %123 = shalt.err (!%p120_p9)
}
 0x137   :  { %75 = dma.vmem_to_hbm [thread:$0]  %s73_s19, 128, %s159_s1, [#allocation4]  }
 0x138   :  { %134 = dma.done.wait [#allocation4], 128  }
 0x139   :  { %135 = vsyncadd [#allocation4], 4294967168 }
 0x13a   :  { %79 = vsyncpa [#allocation3], 1 }
 0x13b   :  { %80 = vsyncpa [#allocation4], 1 }

</bundles_post_ra>
